<compile_context>
chip_gen: v5e
topology: v5e:2x2
jax: 0.10.0
libtpu: 0.0.40
codegen_flags: <defaults>
</compile_context>

<pallas_src>
import math

import jax
import jax.numpy as jnp
from jax.experimental import pallas as pl
from jax.experimental.pallas import tpu as pltpu

# Lane-aligned (padded) feature widths.
H1_PAD = 256     # 250 -> 256
H2_PAD = 128     # 100 -> 128
OUT_PAD = 128    # 10  -> 128


def mlp_kernel(x_ref, w1_ref, b1_ref, w2_ref, b2_ref, w3_ref, b3_ref,
               y_ref, h2_ref):
    x = x_ref[...]                                                    # [TM, D_in] bf16

    # h_1 = relu(x @ W1 + b1)   (MXU bf16, f32 accumulate, f32 elementwise)
    h1 = jnp.dot(x, w1_ref[...], preferred_element_type=jnp.float32)
    h1 = jnp.maximum(h1 + b1_ref[...], 0.0)                           # [TM, 256] f32

    # h_2 = relu(h_1 @ W2 + b2)
    h2 = jnp.dot(h1.astype(w2_ref.dtype), w2_ref[...],
                 preferred_element_type=jnp.float32)
    h2 = jnp.maximum(h2 + b2_ref[...], 0.0)                           # [TM, 128] f32

    # y_pred = h_2 @ W3 + b3
    y = jnp.dot(h2.astype(w3_ref.dtype), w3_ref[...],
                preferred_element_type=jnp.float32)
    y = y + b3_ref[...]                                               # [TM, 128] f32

    h2_ref[...] = h2
    y_ref[...] = y


def _pad2d(a, rows, cols):
    return jnp.pad(a, ((0, rows - a.shape[0]), (0, cols - a.shape[1])))


def mlp_forward(x, params):
    """x: [B, C, H, W] (NCHW). Returns (y_pred [B, out_dim], h_2 [B, 100])."""
    w1, b1, w2, b2, w3, b3 = params
    batch_size = x.shape[0]
    x2d = x.reshape(batch_size, -1).astype(jnp.float32)   # torch .view(B, -1)
    d_in = x2d.shape[1]                                    # 784 (already 8-aligned)
    h2_dim = w2.shape[1]                                   # 100 (public width)
    out_dim = w3.shape[1]                                  # 10  (public width)

    # --- pad features to lane-aligned widths; pad batch to an M tile multiple ---
    if batch_size >= 256:
        tm = 256
    else:
        tm = max(16, 16 * pl.cdiv(batch_size, 16))         # bf16-friendly sublanes
    b_pad = tm * pl.cdiv(batch_size, tm)
    n_tiles = b_pad // tm

    x_p = _pad2d(x2d, b_pad, d_in).astype(jnp.bfloat16)
    w1_p = _pad2d(w1, d_in, H1_PAD).astype(jnp.bfloat16)
    w2_p = _pad2d(w2, H1_PAD, H2_PAD).astype(jnp.bfloat16)
    w3_p = _pad2d(w3, H2_PAD, OUT_PAD).astype(jnp.bfloat16)
    b1_p = _pad2d(b1.astype(jnp.float32), 1, H1_PAD)        # padded entries are 0
    b2_p = _pad2d(b2.astype(jnp.float32), 1, H2_PAD)
    b3_p = _pad2d(b3.astype(jnp.float32), 1, OUT_PAD)

    const = lambda shape: pl.BlockSpec(shape, lambda i: (0, 0))   # weights stay resident

    flops = 2 * b_pad * (d_in * H1_PAD + H1_PAD * H2_PAD + H2_PAD * OUT_PAD)
    bytes_accessed = (x_p.size * 2 + (w1_p.size + w2_p.size + w3_p.size) * 2
                      + (b1_p.size + b2_p.size + b3_p.size) * 4
                      + b_pad * (OUT_PAD + H2_PAD) * 4)

    y_pad, h2_pad = pl.pallas_call(
        mlp_kernel,
        out_shape=(
            jax.ShapeDtypeStruct((b_pad, OUT_PAD), jnp.float32),
            jax.ShapeDtypeStruct((b_pad, H2_PAD), jnp.float32),
        ),
        grid=(n_tiles,),
        in_specs=[
            pl.BlockSpec((tm, d_in), lambda i: (i, 0)),
            const((d_in, H1_PAD)), const((1, H1_PAD)),
            const((H1_PAD, H2_PAD)), const((1, H2_PAD)),
            const((H2_PAD, OUT_PAD)), const((1, OUT_PAD)),
        ],
        out_specs=(
            pl.BlockSpec((tm, OUT_PAD), lambda i: (i, 0)),
            pl.BlockSpec((tm, H2_PAD), lambda i: (i, 0)),
        ),
        compiler_params=pltpu.CompilerParams(
            dimension_semantics=("parallel",)),
        cost_estimate=pl.CostEstimate(flops=flops, transcendentals=0,
                                      bytes_accessed=bytes_accessed),
    )(x_p, w1_p, b1_p, w2_p, b2_p, w3_p, b3_p)

    # Slice back to the public (unpadded) widths.
    return y_pad[:batch_size, :out_dim], h2_pad[:batch_size, :h2_dim]


def init_linear(key, in_features, out_features):
    """Deterministic init matching nn.Linear's default U(-1/sqrt(fan_in), +)."""
    kw, kb = jax.random.split(key)
    bound = 1.0 / math.sqrt(in_features)
    # Stored as (in, out): transpose of PyTorch's (out, in) weight layout.
    w = jax.random.uniform(kw, (in_features, out_features), jnp.float32,
                           minval=-bound, maxval=bound)
    b = jax.random.uniform(kb, (1, out_features), jnp.float32,
                           minval=-bound, maxval=bound)
    return w, b


if __name__ == "__main__":
    key = jax.random.PRNGKey(0)
    k_x, k1, k2, k3 = jax.random.split(key, 4)

    # MNIST-style digit input: batch=2, NCHW [2, 1, 28, 28] -> input_dim=784
    B, C, H, W = 2, 1, 28, 28
    input_dim = C * H * W
    output_dim = 10

    x = jax.random.normal(k_x, (B, C, H, W), jnp.float32)

    w1, b1 = init_linear(k1, input_dim, 250)
    w2, b2 = init_linear(k2, 250, 100)
    w3, b3 = init_linear(k3, 100, output_dim)
    params = (w1, b1, w2, b2, w3, b3)

    y_pred, h2 = mlp_forward(x, params)
    jax.block_until_ready((y_pred, h2))
    assert y_pred.shape == (B, output_dim) and h2.shape == (B, 100)

    # Reference in plain JAX using the same bf16 MXU inputs / f32 accumulation.
    x2d = x.reshape(B, -1).astype(jnp.bfloat16)
    h1_ref = jnp.maximum(
        jnp.dot(x2d, w1.astype(jnp.bfloat16),
                preferred_element_type=jnp.float32) + b1, 0.0)
    h2_ref = jnp.maximum(
        jnp.dot(h1_ref.astype(jnp.bfloat16), w2.astype(jnp.bfloat16),
                preferred_element_type=jnp.float32) + b2, 0.0)
    y_ref = jnp.dot(h2_ref.astype(jnp.bfloat16), w3.astype(jnp.bfloat16),
                    preferred_element_type=jnp.float32) + b3

    assert jnp.allclose(y_pred, y_ref, atol=1e-3, rtol=1e-3)
    assert jnp.allclose(h2, h2_ref, atol=1e-3, rtol=1e-3)

    # Sanity vs full-f32 math (bf16 weight cast gives ~0.4% relative error).
    h1_f = jnp.maximum(x.reshape(B, -1) @ w1 + b1, 0.0)
    h2_f = jnp.maximum(h1_f @ w2 + b2, 0.0)
    y_f = h2_f @ w3 + b3
    assert jnp.allclose(y_pred, y_f, atol=5e-2, rtol=5e-2)

    print("KERNEL_OK")
</pallas_src>

<mosaic_0001>
module attributes {stable_mosaic.version = 11 : i64} {
  func.func @mlp_kernel(%arg0: i32, %arg1: memref<16x784xbf16, #tpu.memory_space<vmem>>, %arg2: memref<784x256xbf16, #tpu.memory_space<vmem>>, %arg3: memref<1x256xf32, #tpu.memory_space<vmem>>, %arg4: memref<256x128xbf16, #tpu.memory_space<vmem>>, %arg5: memref<1x128xf32, #tpu.memory_space<vmem>>, %arg6: memref<128x128xbf16, #tpu.memory_space<vmem>>, %arg7: memref<1x128xf32, #tpu.memory_space<vmem>>, %arg8: memref<16x128xf32, #tpu.memory_space<vmem>>, %arg9: memref<16x128xf32, #tpu.memory_space<vmem>>) attributes {dimension_semantics = [#tpu.dimension_semantics<parallel>], iteration_bounds = array<i64: 1>, scalar_prefetch = 0 : i64, scratch_operands = 0 : i64, tpu.core_type = #tpu.core_type<tc>, window_params = [{transform_indices = @transform_0, window_bounds = array<i64: 16, 784>}, {pipeline_mode = #tpu.pipeline_mode<synchronous>, transform_indices = @transform_1, window_bounds = array<i64: 784, 256>}, {pipeline_mode = #tpu.pipeline_mode<synchronous>, transform_indices = @transform_2, window_bounds = array<i64: 1, 256>}, {pipeline_mode = #tpu.pipeline_mode<synchronous>, transform_indices = @transform_3, window_bounds = array<i64: 256, 128>}, {pipeline_mode = #tpu.pipeline_mode<synchronous>, transform_indices = @transform_4, window_bounds = array<i64: 1, 128>}, {pipeline_mode = #tpu.pipeline_mode<synchronous>, transform_indices = @transform_5, window_bounds = array<i64: 128, 128>}, {pipeline_mode = #tpu.pipeline_mode<synchronous>, transform_indices = @transform_6, window_bounds = array<i64: 1, 128>}, {transform_indices = @transform_7, window_bounds = array<i64: 16, 128>}, {transform_indices = @transform_8, window_bounds = array<i64: 16, 128>}]} {
    %c0 = arith.constant 0 : index
    %c0_0 = arith.constant 0 : index
    %0 = vector.load %arg1[%c0, %c0_0] : memref<16x784xbf16, #tpu.memory_space<vmem>>, vector<16x784xbf16>
    %c0_1 = arith.constant 0 : index
    %c0_2 = arith.constant 0 : index
    %1 = vector.load %arg2[%c0_1, %c0_2] : memref<784x256xbf16, #tpu.memory_space<vmem>>, vector<784x256xbf16>
    %cst = arith.constant dense<0.000000e+00> : vector<16x256xf32>
    %2 = tpu.matmul %0, %1, %cst {dimension_numbers = #tpu.dot_dimension_numbers<[1], [0], [0], [1], [0, 0, 1, 1], [], []>} : vector<16x784xbf16>, vector<784x256xbf16>, vector<16x256xf32> -> vector<16x256xf32>
    %c0_3 = arith.constant 0 : index
    %c0_4 = arith.constant 0 : index
    %3 = vector.load %arg3[%c0_3, %c0_4] : memref<1x256xf32, #tpu.memory_space<vmem>>, vector<1x256xf32>
    %4 = vector.broadcast %3 : vector<1x256xf32> to vector<16x256xf32>
    %5 = arith.addf %2, %4 : vector<16x256xf32>
    %cst_5 = arith.constant 0.000000e+00 : f32
    %6 = vector.broadcast %cst_5 : f32 to vector<16x256xf32>
    %7 = arith.maximumf %5, %6 : vector<16x256xf32>
    %8 = arith.truncf %7 : vector<16x256xf32> to vector<16x256xbf16>
    %c0_6 = arith.constant 0 : index
    %c0_7 = arith.constant 0 : index
    %9 = vector.load %arg4[%c0_6, %c0_7] : memref<256x128xbf16, #tpu.memory_space<vmem>>, vector<256x128xbf16>
    %cst_8 = arith.constant dense<0.000000e+00> : vector<16x128xf32>
    %10 = tpu.matmul %8, %9, %cst_8 {dimension_numbers = #tpu.dot_dimension_numbers<[1], [0], [0], [1], [0, 0, 1, 1], [], []>} : vector<16x256xbf16>, vector<256x128xbf16>, vector<16x128xf32> -> vector<16x128xf32>
    %c0_9 = arith.constant 0 : index
    %c0_10 = arith.constant 0 : index
    %11 = vector.load %arg5[%c0_9, %c0_10] : memref<1x128xf32, #tpu.memory_space<vmem>>, vector<1x128xf32>
    %12 = vector.broadcast %11 : vector<1x128xf32> to vector<16x128xf32>
    %13 = arith.addf %10, %12 : vector<16x128xf32>
    %cst_11 = arith.constant 0.000000e+00 : f32
    %14 = vector.broadcast %cst_11 : f32 to vector<16x128xf32>
    %15 = arith.maximumf %13, %14 : vector<16x128xf32>
    %16 = arith.truncf %15 : vector<16x128xf32> to vector<16x128xbf16>
    %c0_12 = arith.constant 0 : index
    %c0_13 = arith.constant 0 : index
    %17 = vector.load %arg6[%c0_12, %c0_13] : memref<128x128xbf16, #tpu.memory_space<vmem>>, vector<128x128xbf16>
    %cst_14 = arith.constant dense<0.000000e+00> : vector<16x128xf32>
    %18 = tpu.matmul %16, %17, %cst_14 {dimension_numbers = #tpu.dot_dimension_numbers<[1], [0], [0], [1], [0, 0, 1, 1], [], []>} : vector<16x128xbf16>, vector<128x128xbf16>, vector<16x128xf32> -> vector<16x128xf32>
    %c0_15 = arith.constant 0 : index
    %c0_16 = arith.constant 0 : index
    %19 = vector.load %arg7[%c0_15, %c0_16] : memref<1x128xf32, #tpu.memory_space<vmem>>, vector<1x128xf32>
    %20 = vector.broadcast %19 : vector<1x128xf32> to vector<16x128xf32>
    %21 = arith.addf %18, %20 : vector<16x128xf32>
    %c0_17 = arith.constant 0 : index
    %c0_18 = arith.constant 0 : index
    %22 = vector.load %arg9[%c0_17, %c0_18] : memref<16x128xf32, #tpu.memory_space<vmem>>, vector<16x128xf32>
    tpu.vector_store %arg9[%c0_17, %c0_18], %15 {strides = array<i32>} : memref<16x128xf32, #tpu.memory_space<vmem>>, vector<16x128xf32>,
    %c0_19 = arith.constant 0 : index
    %c0_20 = arith.constant 0 : index
    %23 = vector.load %arg8[%c0_19, %c0_20] : memref<16x128xf32, #tpu.memory_space<vmem>>, vector<16x128xf32>
    tpu.vector_store %arg8[%c0_19, %c0_20], %21 {strides = array<i32>} : memref<16x128xf32, #tpu.memory_space<vmem>>, vector<16x128xf32>,
    return
  }
  func.func @transform_0(%arg0: i32) -> (i32, i32) {
    %c0_i32 = arith.constant 0 : i32
    %c0_i32_0 = arith.constant 0 : i32
    return %arg0, %c0_i32 : i32, i32
  }
  func.func @transform_1(%arg0: i32) -> (i32, i32) {
    %c0_i32 = arith.constant 0 : i32
    %c0_i32_0 = arith.constant 0 : i32
    %c0_i32_1 = arith.constant 0 : i32
    return %c0_i32, %c0_i32_0 : i32, i32
  }
  func.func @transform_2(%arg0: i32) -> (i32, i32) {
    %c0_i32 = arith.constant 0 : i32
    %c0_i32_0 = arith.constant 0 : i32
    %c0_i32_1 = arith.constant 0 : i32
    return %c0_i32, %c0_i32_0 : i32, i32
  }
  func.func @transform_3(%arg0: i32) -> (i32, i32) {
    %c0_i32 = arith.constant 0 : i32
    %c0_i32_0 = arith.constant 0 : i32
    %c0_i32_1 = arith.constant 0 : i32
    return %c0_i32, %c0_i32_0 : i32, i32
  }
  func.func @transform_4(%arg0: i32) -> (i32, i32) {
    %c0_i32 = arith.constant 0 : i32
    %c0_i32_0 = arith.constant 0 : i32
    %c0_i32_1 = arith.constant 0 : i32
    return %c0_i32, %c0_i32_0 : i32, i32
  }
  func.func @transform_5(%arg0: i32) -> (i32, i32) {
    %c0_i32 = arith.constant 0 : i32
    %c0_i32_0 = arith.constant 0 : i32
    %c0_i32_1 = arith.constant 0 : i32
    return %c0_i32, %c0_i32_0 : i32, i32
  }
  func.func @transform_6(%arg0: i32) -> (i32, i32) {
    %c0_i32 = arith.constant 0 : i32
    %c0_i32_0 = arith.constant 0 : i32
    %c0_i32_1 = arith.constant 0 : i32
    return %c0_i32, %c0_i32_0 : i32, i32
  }
  func.func @transform_7(%arg0: i32) -> (i32, i32) {
    %c0_i32 = arith.constant 0 : i32
    %c0_i32_0 = arith.constant 0 : i32
    return %arg0, %c0_i32 : i32, i32
  }
  func.func @transform_8(%arg0: i32) -> (i32, i32) {
    %c0_i32 = arith.constant 0 : i32
    %c0_i32_0 = arith.constant 0 : i32
    return %arg0, %c0_i32 : i32, i32
  }
}

</mosaic_0001>

<bundles_post_ra>
// kernel: tpu_custom_call.1
= control target key start
LH: loop header
LB: loop body
LE: loop exit
PB: predicated region body
PF: predicated region fallthrough
CT: control target
= control target key end

     0   :  { %14 = vsyncpa [#allocation3], 0  ;;  %s2206_s0 = inlined_call_operand.hbm [shape: bf16[16,784], index: 0, kind: input, shape index: {}]   ;;  %s2207_s1 = inlined_call_operand.hbm [shape: bf16[784,256], index: 1, kind: input, shape index: {}]   ;;  %s2208_s2 = inlined_call_operand.hbm [shape: f32[1,256], index: 2, kind: input, shape index: {}]   ;;  %s2209_s3 = inlined_call_operand.hbm [shape: bf16[256,128], index: 3, kind: input, shape index: {}]   ;;  %s2210_s4 = inlined_call_operand.vmem [shape: f32[1,128], index: 4, kind: input, shape index: {}]   ;;  %s2211_s5 = inlined_call_operand.hbm [shape: bf16[128,128], index: 5, kind: input, shape index: {}]   ;;  %s2212_s6 = inlined_call_operand.vmem [shape: f32[1,128], index: 6, kind: input, shape index: {}]   ;;  %s2213_s7 = inlined_call_operand.hbm [shape: f32[16,128], index: 7, kind: output, shape index: {0}]   ;;  %s2214_s8 = inlined_call_operand.hbm [shape: f32[16,128], index: 8, kind: output, shape index: {1}]  }
   0x1   :  { %15 = vsyncpa [#allocation6], 0 }
   0x2   :  { %16 = vsyncpa [#allocation9], 0 }
   0x3   :  { %17 = vsyncpa [#allocation4], 0  ;;  %s36_s29 = sshll.u32 %s2207_s1, 4  ;;  %s37_s29 = int_to_ptr.hbm [resolvable:$true] %s36_s29 }
   0x4   :  { %18 = vsyncpa [#allocation13], 0  ;;  %s2078_s30 = smov [#allocation5]   ;;  %s60_s12 = sshll.u32 %s2209_s3, 4  ;;  %s61_s12 = int_to_ptr.hbm [resolvable:$true] %s60_s12 }
   0x5   :  { %s38_s9 = sshll.u32 %s2078_s30, 4  ;;  %s2079_s13 = smov 128   ;;  %s39_s9 = int_to_ptr.vmem [resolvable:$true] %s38_s9 }
   0x6   :  { %s2080_s14 = smov 8   ;;  %s2081_s15 = smov [#allocation8]  }
   0x7   :  { %44 = dma.hbm_to_vmem [thread:$0]  %s37_s29, 12544, %s39_s9, [#allocation6], %s2079_s13, %s2079_s13, %s2080_s14  }
   0x8   :  { %s62_s16 = sshll.u32 %s2081_s15, 4  ;;  %s2082_s1 = smov 64   ;;  %s63_s16 = int_to_ptr.vmem [resolvable:$true] %s62_s16 }
   0x9   :  { %s2083_s17 = smov 4   ;;  %s23_s20 = sshll.u32 %s2206_s0, 4  ;;  %s24_s20 = int_to_ptr.hbm [resolvable:$true] %s23_s20 }
   0xa   :  { %68 = dma.hbm_to_vmem [thread:$0]  %s61_s12, 2048, %s63_s16, [#allocation9], %s2082_s1, %s2082_s1, %s2083_s17  }
   0xb   :  { %s2084_s21 = smov [#allocation2]   ;;  %s50_s24 = sshll.u32 %s2208_s2, 4  ;;  %s51_s24 = int_to_ptr.hbm [resolvable:$true] %s50_s24 }
   0xc   :  { %s25_s3 = sshll.u32 %s2084_s21, 4  ;;  %s2085_s25 = smov 448   ;;  %s26_s3 = int_to_ptr.vmem [resolvable:$true] %s25_s3 }
   0xd   :  { %s2086_s26 = smov 28   ;;  %s2087_s27 = smov [#allocation7]  }
   0xe   :  { %31 = dma.hbm_to_vmem [thread:$0]  %s24_s20, 896, %s26_s3, [#allocation3], %s2085_s25, %s2085_s25, %s2086_s26  }
   0xf   :  { %s52_s28 = sshll.u32 %s2087_s27, 4  ;;  %s75_s9 = sshll.u32 %s2211_s5, 4  ;;  %s53_s28 = int_to_ptr.vmem [resolvable:$true] %s52_s28  ;;  %s76_s9 = int_to_ptr.hbm [resolvable:$true] %s75_s9 }
  0x10   :  { %55 = dma.hbm_to_vmem [thread:$0]  %s51_s24, 32, %s53_s28, [#allocation6]  }
  0x11   :  { %s2088_s0 = smov [#allocation10]  }
  0x12   :  { %s77_s10 = sshll.u32 %s2088_s0, 4  ;;  %s78_s10 = int_to_ptr.vmem [resolvable:$true] %s77_s10 }
  0x13   :  { %83 = dma.hbm_to_vmem [thread:$0]  %s76_s9, 1024, %s78_s10, [#allocation9], %s2082_s1, %s2082_s1, %s2083_s17  }
  0x14   :  { %2068 = dma.done.wait [#allocation3], 896  }
  0x15   :  { %2069 = vsyncadd [#allocation3], 4294966400 }
  0x16   :  { %2070 = dma.done.wait [#allocation6], 12576  }
  0x17   :  { %2071 = vsyncadd [#allocation6], 4294954720 }
  0x18   :  { %2072 = dma.done.wait [#allocation9], 3072  }
  0x19   :  { %2073 = vsyncadd [#allocation9], 4294964224  ;;  %v1324_v0 = vld [vmem:[#allocation5 + $0x70] sm:$0xf]  ;;  %v1778_v1 = vld [vmem:[#allocation5 + $0x74] sm:$0xf0] }
  0x1a   :  { %v1452_v2 = vld [vmem:[#allocation5 + $0x170] sm:$0xf]  ;;  %v1325_v3 = vor.u32 %v1778_v1, %v1324_v0  ;;  %v1810_v4 = vld [vmem:[#allocation5 + $0x174] sm:$0xf0]  ;;  %v1316_v11 = vld [vmem:[#allocation5 + $0x60] sm:$0xf] }
  0x1b   :  { %v1516_v5 = vld [vmem:[#allocation5 + $0x1f0] sm:$0xf]  ;;  %v1826_v6 = vld [vmem:[#allocation5 + $0x1f4] sm:$0xf0]  ;;  %v1453_v7 = vor.u32 %v1810_v4, %v1452_v2  ;;  %v1776_v13 = vld [vmem:[#allocation5 + $0x64] sm:$0xf0] }
  0x1c   :  { %v1517_v8 = vor.u32 %v1826_v6, %v1516_v5  ;;  %v1388_v9 = vld [vmem:[#allocation5 + $0xf0] sm:$0xf]  ;;  %v1794_v10 = vld [vmem:[#allocation5 + $0xf4] sm:$0xf0]  ;;  %748 = vmatpush.bf16.msra.mxu0 %v1325_v3  ;;  %v1444_v14 = vld [vmem:[#allocation5 + $0x160] sm:$0xf]  ;;  %v1317_v16 = vor.u32 %v1776_v13, %v1316_v11 }
  0x1d   :  { %v1389_v12 = vor.u32 %v1794_v10, %v1388_v9  ;;  %v1808_v15 = vld [vmem:[#allocation5 + $0x164] sm:$0xf0]  ;;  %776 = vmatpush.bf16.msra.mxu2 %v1453_v7  ;;  %v1508_v18 = vld [vmem:[#allocation5 + $0x1e0] sm:$0xf]  ;;  %v1308_v23 = vld [vmem:[#allocation5 + $0x50] sm:$0xf] }
  0x1e   :  { %790 = vmatpush.bf16.msra.mxu3 %v1517_v8  ;;  %v1445_v17 = vor.u32 %v1808_v15, %v1444_v14  ;;  %v1824_v19 = vld [vmem:[#allocation5 + $0x1e4] sm:$0xf0]  ;;  %v1380_v20 = vld [vmem:[#allocation5 + $0xe0] sm:$0xf]  ;;  %v1774_v24 = vld [vmem:[#allocation5 + $0x54] sm:$0xf0] }
  0x1f   :  { %762 = vmatpush.bf16.msra.mxu1 %v1389_v12  ;;  %v1509_v21 = vor.u32 %v1824_v19, %v1508_v18  ;;  %v1792_v22 = vld [vmem:[#allocation5 + $0xe4] sm:$0xf0]  ;;  %v1436_v26 = vld [vmem:[#allocation5 + $0x150] sm:$0xf]  ;;  %v1806_v27 = vld [vmem:[#allocation5 + $0x154] sm:$0xf0]  ;;  %v1309_v29 = vor.u32 %v1774_v24, %v1308_v23 }
  0x20   :  { %v1381_v25 = vor.u32 %v1792_v22, %v1380_v20  ;;  %v1500_v28 = vld [vmem:[#allocation5 + $0x1d0] sm:$0xf]  ;;  %749 = vmatpush.bf16.msra.mxu0 %v1317_v16  ;;  %v1822_v30 = vld [vmem:[#allocation5 + $0x1d4] sm:$0xf0]  ;;  %v1437_v33 = vor.u32 %v1806_v27, %v1436_v26  ;;  %v1300_v35 = vld [vmem:[#allocation5 + $0x40] sm:$0xf] }
  0x21   :  { %v1372_v31 = vld [vmem:[#allocation5 + $0xd0] sm:$0xf]  ;;  %v1790_v32 = vld [vmem:[#allocation5 + $0xd4] sm:$0xf0]  ;;  %777 = vmatpush.bf16.msra.mxu2 %v1445_v17  ;;  %v1501_v34 = vor.u32 %v1822_v30, %v1500_v28  ;;  %v1772_v36 = vld [vmem:[#allocation5 + $0x44] sm:$0xf0] }
  0x22   :  { %791 = vmatpush.bf16.msra.mxu3 %v1509_v21  ;;  %v1428_v37 = vld [vmem:[#allocation5 + $0x140] sm:$0xf]  ;;  %v1373_v38 = vor.u32 %v1790_v32, %v1372_v31  ;;  %v1804_v39 = vld [vmem:[#allocation5 + $0x144] sm:$0xf0]  ;;  %v1301_v44 = vor.u32 %v1772_v36, %v1300_v35  ;;  %v1292_v47 = vld [vmem:[#allocation5 + $0x30] sm:$0xf] }
  0x23   :  { %763 = vmatpush.bf16.msra.mxu1 %v1381_v25  ;;  %v1492_v40 = vld [vmem:[#allocation5 + $0x1c0] sm:$0xf]  ;;  %v1820_v41 = vld [vmem:[#allocation5 + $0x1c4] sm:$0xf0]  ;;  %v1429_v45 = vor.u32 %v1804_v39, %v1428_v37  ;;  %v1770_v48 = vld [vmem:[#allocation5 + $0x34] sm:$0xf0] }
  0x24   :  { %v1364_v42 = vld [vmem:[#allocation5 + $0xc0] sm:$0xf]  ;;  %v1788_v43 = vld [vmem:[#allocation5 + $0xc4] sm:$0xf0]  ;;  %750 = vmatpush.bf16.msra.mxu0 %v1309_v29  ;;  %v1493_v46 = vor.u32 %v1820_v41, %v1492_v40  ;;  %v1420_v49 = vld [vmem:[#allocation5 + $0x130] sm:$0xf]  ;;  %v1293_v56 = vor.u32 %v1770_v48, %v1292_v47 }
  0x25   :  { %778 = vmatpush.bf16.msra.mxu2 %v1437_v33  ;;  %v1365_v50 = vor.u32 %v1788_v43, %v1364_v42  ;;  %v1802_v51 = vld [vmem:[#allocation5 + $0x134] sm:$0xf0]  ;;  %v1484_v52 = vld [vmem:[#allocation5 + $0x1b0] sm:$0xf]  ;;  %v1284_v59 = vld [vmem:[#allocation5 + $0x20] sm:$0xf] }
  0x26   :  { %792 = vmatpush.bf16.msra.mxu3 %v1501_v34  ;;  %v1818_v53 = vld [vmem:[#allocation5 + $0x1b4] sm:$0xf0]  ;;  %v1356_v54 = vld [vmem:[#allocation5 + $0xb0] sm:$0xf]  ;;  %v1421_v57 = vor.u32 %v1802_v51, %v1420_v49  ;;  %v1768_v60 = vld [vmem:[#allocation5 + $0x24] sm:$0xf0] }
  0x27   :  { %764 = vmatpush.bf16.msra.mxu1 %v1373_v38  ;;  %v1786_v55 = vld [vmem:[#allocation5 + $0xb4] sm:$0xf0]  ;;  %v1485_v58 = vor.u32 %v1818_v53, %v1484_v52  ;;  %v1412_v61 = vld [vmem:[#allocation5 + $0x120] sm:$0xf]  ;;  %v1800_v63 = vld [vmem:[#allocation5 + $0x124] sm:$0xf0]  ;;  %v1285_v4 = vor.u32 %v1768_v60, %v1284_v59 }
  0x28   :  { %751 = vmatpush.bf16.msra.mxu0 %v1301_v44  ;;  %v1357_v62 = vor.u32 %v1786_v55, %v1356_v54  ;;  %v1476_v0 = vld [vmem:[#allocation5 + $0x1a0] sm:$0xf]  ;;  %v1816_v1 = vld [vmem:[#allocation5 + $0x1a4] sm:$0xf0]  ;;  %v1276_v5 = vld [vmem:[#allocation5 + $0x10] sm:$0xf]  ;;  %v1413_v6 = vor.u32 %v1800_v63, %v1412_v61 }
  0x29   :  { %779 = vmatpush.bf16.msra.mxu2 %v1429_v45  ;;  %v1348_v2 = vld [vmem:[#allocation5 + $0xa0] sm:$0xf]  ;;  %v1784_v3 = vld [vmem:[#allocation5 + $0xa4] sm:$0xf0]  ;;  %v1477_v7 = vor.u32 %v1816_v1, %v1476_v0  ;;  %v1766_v8 = vld [vmem:[#allocation5 + $0x14] sm:$0xf0] }
  0x2a   :  { %793 = vmatpush.bf16.msra.mxu3 %v1493_v46  ;;  %v1404_v9 = vld [vmem:[#allocation5 + $0x110] sm:$0xf]  ;;  %v1798_v10 = vld [vmem:[#allocation5 + $0x114] sm:$0xf0]  ;;  %v1349_v11 = vor.u32 %v1784_v3, %v1348_v2  ;;  %v1268_v16 = vld [vmem:[#allocation5] sm:$0xf]  ;;  %v1277_v18 = vor.u32 %v1766_v8, %v1276_v5 }
  0x2b   :  { %765 = vmatpush.bf16.msra.mxu1 %v1365_v50  ;;  %v1468_v12 = vld [vmem:[#allocation5 + $0x190] sm:$0xf]  ;;  %v1814_v13 = vld [vmem:[#allocation5 + $0x194] sm:$0xf0]  ;;  %v1764_v17 = vld [vmem:[#allocation5 + $0x4] sm:$0xf0]  ;;  %v1405_v23 = vor.u32 %v1798_v10, %v1404_v9 }
  0x2c   :  { %752 = vmatpush.bf16.msra.mxu0 %v1293_v56  ;;  %v1340_v14 = vld [vmem:[#allocation5 + $0x90] sm:$0xf]  ;;  %v1782_v15 = vld [vmem:[#allocation5 + $0x94] sm:$0xf0]  ;;  %v1396_v19 = vld [vmem:[#allocation5 + $0x100] sm:$0xf]  ;;  %v1469_v24 = vor.u32 %v1814_v13, %v1468_v12  ;;  %v1269_v35 = vor.u32 %v1764_v17, %v1268_v16 }
  0x2d   :  { %780 = vmatpush.bf16.msra.mxu2 %v1421_v57  ;;  %v1796_v20 = vld [vmem:[#allocation5 + $0x104] sm:$0xf0]  ;;  %v1460_v21 = vld [vmem:[#allocation5 + $0x180] sm:$0xf]  ;;  %v1580_v25 = vld [vmem:[#allocation5 + $0x270] sm:$0xf]  ;;  %v1341_v28 = vor.u32 %v1782_v15, %v1340_v14 }
  0x2e   :  { %794 = vmatpush.bf16.msra.mxu3 %v1485_v58  ;;  %v1812_v22 = vld [vmem:[#allocation5 + $0x184] sm:$0xf0]  ;;  %v1842_v26 = vld [vmem:[#allocation5 + $0x274] sm:$0xf0]  ;;  %v1777_v27 = vld [vmem:[#allocation5 + $0x74] sm:$0xf]  ;;  %v1397_v39 = vor.u32 %v1796_v20, %v1396_v19 }
  0x2f   :  { %766 = vmatpush.bf16.msra.mxu1 %v1357_v62  ;;  %v1326_v29 = vld [vmem:[#allocation5 + $0x78] sm:$0xf0]  ;;  %v1332_v30 = vld [vmem:[#allocation5 + $0x80] sm:$0xf]  ;;  %v1780_v31 = vld [vmem:[#allocation5 + $0x84] sm:$0xf0]  ;;  %v1461_v40 = vor.u32 %v1812_v22, %v1460_v21  ;;  %v1581_v44 = vor.u32 %v1842_v26, %v1580_v25 }
  0x30   :  { %753 = vmatpush.bf16.msra.mxu0 %v1285_v4  ;;  %v1248_v32 = vld [vmem:[#allocation2 + $0x8] sm:$0xf]  ;;  %v1760_v33 = vld [vmem:[#allocation2 + $0x20] sm:$0xf0]  ;;  %v1858_v36 = vld [vmem:[#allocation5 + $0x2f4] sm:$0xf0]  ;;  %v1329_v45 = vor.u32 %v1777_v27, %v1326_v29  ;;  %v1333_v49 = vor.u32 %v1780_v31, %v1332_v30 }
  0x31   :  { %781 = vmatpush.bf16.msra.mxu2 %v1413_v6  ;;  %v1644_v34 = vld [vmem:[#allocation5 + $0x2f0] sm:$0xf]  ;;  %v1652_v37 = vld [vmem:[#allocation5 + $0x300] sm:$0xf]  ;;  %v1860_v38 = vld [vmem:[#allocation5 + $0x304] sm:$0xf0]  ;;  %v2154_v54 = vor.u32 %v1760_v33, %v1248_v32 }
  0x32   :  { %795 = vmatpush.bf16.msra.mxu3 %v1477_v7  ;;  %v1793_v41 = vld [vmem:[#allocation5 + $0xf4] sm:$0xf]  ;;  %v1390_v42 = vld [vmem:[#allocation5 + $0xf8] sm:$0xf0]  ;;  %v1240_v43 = vld [vmem:[#allocation2] sm:$0xf]  ;;  %v1653_v50 = vor.u32 %v1860_v38, %v1652_v37  ;;  %v1645_v55 = vor.u32 %v1858_v36, %v1644_v34 }
  0x33   :  { %767 = vmatpush.bf16.msra.mxu1 %v1349_v11  ;;  %v1759_v46 = vld [vmem:[#allocation2 + $0x18] sm:$0xf0]  ;;  %v1757_v47 = vld [vmem:[#allocation2 + $0xc] sm:$0xf]  ;;  %v1250_v48 = vld [vmem:[#allocation2 + $0x24] sm:$0xf0]  ;;  %v1393_v59 = vor.u32 %v1793_v41, %v1390_v42 }
  0x34   :  { %754 = vmatpush.bf16.msra.mxu0 %v1277_v18  ;;  %v1572_v51 = vld [vmem:[#allocation5 + $0x260] sm:$0xf]  ;;  %v1840_v52 = vld [vmem:[#allocation5 + $0x264] sm:$0xf0]  ;;  %v1775_v53 = vld [vmem:[#allocation5 + $0x64] sm:$0xf]  ;;  %v2156_v60 = vor.u32 %v1759_v46, %v1240_v43  ;;  %v2158_v63 = vor.u32 %v1757_v47, %v1250_v48 }
  0x35   :  { %782 = vmatpush.bf16.msra.mxu2 %v1405_v23  ;;  %v1318_v56 = vld [vmem:[#allocation5 + $0x68] sm:$0xf0]  ;;  %v1242_v58 = vld [vmem:[#allocation2 + $0x1c] sm:$0xf0]  ;;  %v1636_v61 = vld [vmem:[#allocation5 + $0x2e0] sm:$0xf]  ;;  %v1573_v0 = vor.u32 %v1840_v52, %v1572_v51 }
  0x36   :  { %796 = vmatpush.bf16.msra.mxu3 %v1469_v24  ;;  %v1756_v57 = vld [vmem:[#allocation2 + $0x4] sm:$0xf]  ;;  %v1856_v62 = vld [vmem:[#allocation5 + $0x2e4] sm:$0xf0]  ;;  %v1791_v1 = vld [vmem:[#allocation5 + $0xe4] sm:$0xf]  ;;  %v1321_v3 = vor.u32 %v1775_v53, %v1318_v56 }
  0x37   :  { %768 = vmatpush.bf16.msra.mxu1 %v1341_v28  ;;  %v1382_v2 = vld [vmem:[#allocation5 + $0xe8] sm:$0xf0]  ;;  %v2160_v4 = vor.u32 %v1756_v57, %v1242_v58  ;;  %v1564_v5 = vld [vmem:[#allocation5 + $0x250] sm:$0xf]  ;;  %v1838_v6 = vld [vmem:[#allocation5 + $0x254] sm:$0xf0]  ;;  %v1637_v7 = vor.u32 %v1856_v62, %v1636_v61 }
  0x38   :  { %755 = vmatpush.bf16.msra.mxu0 %v1269_v35  ;;  %v1773_v8 = vld [vmem:[#allocation5 + $0x54] sm:$0xf]  ;;  %v1310_v9 = vld [vmem:[#allocation5 + $0x58] sm:$0xf0]  ;;  %v1385_v10 = vor.u32 %v1791_v1, %v1382_v2  ;;  %v1628_v11 = vld [vmem:[#allocation5 + $0x2d0] sm:$0xf]  ;;  %v1565_v13 = vor.u32 %v1838_v6, %v1564_v5 }
  0x39   :  { %783 = vmatpush.bf16.msra.mxu2 %v1397_v39  ;;  %v1854_v12 = vld [vmem:[#allocation5 + $0x2d4] sm:$0xf0]  ;;  %v1789_v14 = vld [vmem:[#allocation5 + $0xd4] sm:$0xf]  ;;  %v1374_v15 = vld [vmem:[#allocation5 + $0xd8] sm:$0xf0]  ;;  %v1313_v16 = vor.u32 %v1773_v8, %v1310_v9 }
  0x3a   :  { %797 = vmatpush.bf16.msra.mxu3 %v1461_v40  ;;  %v1556_v17 = vld [vmem:[#allocation5 + $0x240] sm:$0xf]  ;;  %v1836_v18 = vld [vmem:[#allocation5 + $0x244] sm:$0xf0]  ;;  %v1629_v19 = vor.u32 %v1854_v12, %v1628_v11  ;;  %v1771_v20 = vld [vmem:[#allocation5 + $0x44] sm:$0xf]  ;;  %v1377_v22 = vor.u32 %v1789_v14, %v1374_v15 }
  0x3b   :  { %769 = vmatpush.bf16.msra.mxu1 %v1333_v49  ;;  %756 = vmatmul.bf16.vlgmr.msra.gmra.mxu0 %v2156_v60  ;;  %v1302_v21 = vld [vmem:[#allocation5 + $0x48] sm:$0xf0]  ;;  %v1620_v23 = vld [vmem:[#allocation5 + $0x2c0] sm:$0xf]  ;;  %v1852_v24 = vld [vmem:[#allocation5 + $0x2c4] sm:$0xf0]  ;;  %v1557_v25 = vor.u32 %v1836_v18, %v1556_v17 }
  0x3c   :  { %804 = vmatpush.bf16.msrb.mxu0 %v1581_v44  ;;  %784 = vmatmul.bf16.vlgmr.msra.gmra.mxu2 %v2154_v54  ;;  %v1787_v26 = vld [vmem:[#allocation5 + $0xc4] sm:$0xf]  ;;  %v1366_v27 = vld [vmem:[#allocation5 + $0xc8] sm:$0xf0]  ;;  %v1305_v28 = vor.u32 %v1771_v20, %v1302_v21  ;;  %v1548_v29 = vld [vmem:[#allocation5 + $0x230] sm:$0xf]  ;;  %v1621_v31 = vor.u32 %v1852_v24, %v1620_v23 }
  0x3d   :  { %839 = vmatpush.bf16.msrb.mxu2 %v1653_v50  ;;  %798 = vmatmul.bf16.vlgmr.msra.gmra.mxu3 %v2158_v63  ;;  %v1834_v30 = vld [vmem:[#allocation5 + $0x234] sm:$0xf0]  ;;  %v1769_v32 = vld [vmem:[#allocation5 + $0x34] sm:$0xf]  ;;  %v1294_v33 = vld [vmem:[#allocation5 + $0x38] sm:$0xf0]  ;;  %v1369_v35 = vor.u32 %v1787_v26, %v1366_v27 }
  0x3e   :  { %846 = vmatpush.bf16.msrb.mxu3 %v1329_v45  ;;  %770 = vmatmul.bf16.vlgmr.msra.gmra.mxu1 %v2160_v4  ;;  %v1612_v34 = vld [vmem:[#allocation5 + $0x2b0] sm:$0xf]  ;;  %v1850_v36 = vld [vmem:[#allocation5 + $0x2b4] sm:$0xf0]  ;;  %v1264_v37 = vld [vmem:[#allocation2 + $0x18] sm:$0xf]  ;;  %v1549_v39 = vor.u32 %v1834_v30, %v1548_v29  ;;  %v1297_v42 = vor.u32 %v1769_v32, %v1294_v33 }
  0x3f   :  { %818 = vmatpush.bf16.msrb.mxu1 %v1645_v55  ;;  %v1762_v38 = vld [vmem:[#allocation2 + $0x30] sm:$0xf0]  ;;  %v1785_v40 = vld [vmem:[#allocation5 + $0xb4] sm:$0xf]  ;;  %v1540_v43 = vld [vmem:[#allocation5 + $0x220] sm:$0xf]  ;;  %v1613_v45 = vor.u32 %v1850_v36, %v1612_v34 }
  0x40   :  { %805 = vmatpush.bf16.msrb.mxu0 %v1573_v0  ;;  %v1358_v41 = vld [vmem:[#allocation5 + $0xb8] sm:$0xf0]  ;;  %v1832_v44 = vld [vmem:[#allocation5 + $0x224] sm:$0xf0]  ;;  %v1767_v46 = vld [vmem:[#allocation5 + $0x24] sm:$0xf]  ;;  %v2166_v48 = vor.u32 %v1762_v38, %v1264_v37 }
  0x41   :  { %860 = vmatpush.bf16.msra.mxu2 %v1393_v59  ;;  %v1286_v47 = vld [vmem:[#allocation5 + $0x28] sm:$0xf0]  ;;  %v1361_v49 = vor.u32 %v1785_v40, %v1358_v41  ;;  %v1604_v50 = vld [vmem:[#allocation5 + $0x2a0] sm:$0xf]  ;;  %v1848_v51 = vld [vmem:[#allocation5 + $0x2a4] sm:$0xf0]  ;;  %v1541_v52 = vor.u32 %v1832_v44, %v1540_v43 }
  0x42   :  { %847 = vmatpush.bf16.msrb.mxu3 %v1321_v3  ;;  %vm744_vm0 = vcmask 130048   ;;  %v1783_v53 = vld [vmem:[#allocation5 + $0xa4] sm:$0xf]  ;;  %v1350_v55 = vld [vmem:[#allocation5 + $0xa8] sm:$0xf0]  ;;  %v1289_v56 = vor.u32 %v1767_v46, %v1286_v47  ;;  %v1605_v61 = vor.u32 %v1848_v51, %v1604_v50  ;;  %s2089_s11 = smov [#allocation12]  }
  0x43   :  { %819 = vmatpush.bf16.msrb.mxu1 %v1637_v7  ;;  %v1532_v57 = vld [vmem:[#allocation5 + $0x210] sm:$0xf]  ;;  %v1830_v58 = vld [vmem:[#allocation5 + $0x214] sm:$0xf0]  ;;  %v1765_v59 = vld [vmem:[#allocation5 + $0x14] sm:$0xf]  ;;  %v1353_v2 = vor.u32 %v1783_v53, %v1350_v55 }
  0x44   :  { %806 = vmatpush.bf16.msrb.mxu0 %v1565_v13  ;;  %v1278_v62 = vld [vmem:[#allocation5 + $0x18] sm:$0xf0]  ;;  %v1596_v0 = vld [vmem:[#allocation5 + $0x290] sm:$0xf]  ;;  %v1846_v1 = vld [vmem:[#allocation5 + $0x294] sm:$0xf0]  ;;  %v1533_v7 = vor.u32 %v1830_v58, %v1532_v57 }
  0x45   :  { %861 = vmatpush.bf16.msra.mxu2 %v1385_v10  ;;  %v1781_v3 = vld [vmem:[#allocation5 + $0x94] sm:$0xf]  ;;  %v1342_v5 = vld [vmem:[#allocation5 + $0x98] sm:$0xf0]  ;;  %v1524_v6 = vld [vmem:[#allocation5 + $0x200] sm:$0xf]  ;;  %v1281_v11 = vor.u32 %v1765_v59, %v1278_v62  ;;  %v1597_v15 = vor.u32 %v1846_v1, %v1596_v0 }
  0x46   :  { %848 = vmatpush.bf16.msrb.mxu3 %v1313_v16  ;;  %v1828_v8 = vld [vmem:[#allocation5 + $0x204] sm:$0xf0]  ;;  %v1763_v9 = vld [vmem:[#allocation5 + $0x4] sm:$0xf]  ;;  %v1270_v10 = vld [vmem:[#allocation5 + $0x8] sm:$0xf0] }
  0x47   :  { %820 = vmatpush.bf16.msrb.mxu1 %v1629_v19  ;;  %v1809_v12 = vld [vmem:[#allocation5 + $0x174] sm:$0xf]  ;;  %v1454_v13 = vld [vmem:[#allocation5 + $0x178] sm:$0xf0]  ;;  %v1588_v17 = vld [vmem:[#allocation5 + $0x280] sm:$0xf]  ;;  %v1345_v19 = vor.u32 %v1781_v3, %v1342_v5  ;;  %v1525_v23 = vor.u32 %v1828_v8, %v1524_v6  ;;  %v1273_v27 = vor.u32 %v1763_v9, %v1270_v10 }
  0x48   :  { %807 = vmatpush.bf16.msrb.mxu0 %v1557_v25  ;;  %v1841_v14 = vld [vmem:[#allocation5 + $0x274] sm:$0xf]  ;;  %v1582_v16 = vld [vmem:[#allocation5 + $0x278] sm:$0xf0]  ;;  %v1844_v18 = vld [vmem:[#allocation5 + $0x284] sm:$0xf0] }
  0x49   :  { %862 = vmatpush.bf16.msra.mxu2 %v1377_v22  ;;  %v1256_v20 = vld [vmem:[#allocation2 + $0x10] sm:$0xf]  ;;  %v1761_v21 = vld [vmem:[#allocation2 + $0x28] sm:$0xf0]  ;;  %v1779_v22 = vld [vmem:[#allocation5 + $0x84] sm:$0xf]  ;;  %v1585_v32 = vor.u32 %v1841_v14, %v1582_v16  ;;  %v1589_v33 = vor.u32 %v1844_v18, %v1588_v17 }
  0x4a   :  { %849 = vmatpush.bf16.msrb.mxu3 %v1305_v28  ;;  %v1334_v24 = vld [vmem:[#allocation5 + $0x88] sm:$0xf0]  ;;  %v1825_v25 = vld [vmem:[#allocation5 + $0x1f4] sm:$0xf]  ;;  %v1518_v26 = vld [vmem:[#allocation5 + $0x1f8] sm:$0xf0]  ;;  %v1457_v28 = vor.u32 %v1809_v12, %v1454_v13  ;;  %v2170_v37 = vor.u32 %v1761_v21, %v1256_v20 }
  0x4b   :  { %821 = vmatpush.bf16.msrb.mxu1 %v1621_v31  ;;  %v1857_v29 = vld [vmem:[#allocation5 + $0x2f4] sm:$0xf]  ;;  %v1646_v30 = vld [vmem:[#allocation5 + $0x2f8] sm:$0xf0]  ;;  %v1258_v34 = vld [vmem:[#allocation2 + $0x2c] sm:$0xf0]  ;;  %v1337_v38 = vor.u32 %v1779_v22, %v1334_v24  ;;  %v1521_v41 = vor.u32 %v1825_v25, %v1518_v26 }
  0x4c   :  { %808 = vmatpush.bf16.msrb.mxu0 %v1549_v39  ;;  %1658 = vmatmul.msk.bf16.vlgmr.msrb.gmra.mxu2 %vm744_vm0, %v2166_v48  ;;  %v1758_v31 = vld [vmem:[#allocation2 + $0x14] sm:$0xf]  ;;  %v1446_v36 = vld [vmem:[#allocation5 + $0x168] sm:$0xf0]  ;;  %v1839_v39 = vld [vmem:[#allocation5 + $0x264] sm:$0xf] }
  0x4d   :  { %863 = vmatpush.bf16.msra.mxu2 %v1369_v35  ;;  %v1807_v35 = vld [vmem:[#allocation5 + $0x164] sm:$0xf]  ;;  %v1574_v40 = vld [vmem:[#allocation5 + $0x268] sm:$0xf0]  ;;  %v2172_v44 = vor.u32 %v1758_v31, %v1258_v34  ;;  %v1805_v51 = vld [vmem:[#allocation5 + $0x154] sm:$0xf] }
  0x4e   :  { %850 = vmatpush.bf16.msrb.mxu3 %v1297_v42  ;;  %v1649_v42 = vor.u32 %v1857_v29, %v1646_v30  ;;  %v1823_v43 = vld [vmem:[#allocation5 + $0x1e4] sm:$0xf]  ;;  %v1510_v46 = vld [vmem:[#allocation5 + $0x1e8] sm:$0xf0]  ;;  %v1577_v50 = vor.u32 %v1839_v39, %v1574_v40  ;;  %v1837_v53 = vld [vmem:[#allocation5 + $0x254] sm:$0xf] }
  0x4f   :  { %822 = vmatpush.bf16.msrb.mxu1 %v1613_v45  ;;  %v1449_v45 = vor.u32 %v1807_v35, %v1446_v36  ;;  %v1855_v47 = vld [vmem:[#allocation5 + $0x2e4] sm:$0xf]  ;;  %v1566_v55 = vld [vmem:[#allocation5 + $0x258] sm:$0xf0]  ;;  %v1821_v58 = vld [vmem:[#allocation5 + $0x1d4] sm:$0xf] }
  0x50   :  { %809 = vmatpush.bf16.msrb.mxu0 %v1541_v52  ;;  %v1438_v52 = vld [vmem:[#allocation5 + $0x158] sm:$0xf0]  ;;  %v1853_v62 = vld [vmem:[#allocation5 + $0x2d4] sm:$0xf]  ;;  %v1569_v1 = vor.u32 %v1837_v53, %v1566_v55  ;;  %v1430_v3 = vld [vmem:[#allocation5 + $0x148] sm:$0xf0] }
  0x51   :  { %864 = vmatpush.bf16.msra.mxu2 %v1361_v49  ;;  %v1638_v49 = vld [vmem:[#allocation5 + $0x2e8] sm:$0xf0]  ;;  %v1441_v59 = vor.u32 %v1805_v51, %v1438_v52  ;;  %v1630_v0 = vld [vmem:[#allocation5 + $0x2d8] sm:$0xf0]  ;;  %v1835_v5 = vld [vmem:[#allocation5 + $0x244] sm:$0xf] }
  0x52   :  { %851 = vmatpush.bf16.msrb.mxu3 %v1289_v56  ;;  %v1513_v56 = vor.u32 %v1823_v43, %v1510_v46  ;;  %v1641_v57 = vor.u32 %v1855_v47, %v1638_v49  ;;  %v1558_v6 = vld [vmem:[#allocation5 + $0x248] sm:$0xf0]  ;;  %v1633_v8 = vor.u32 %v1853_v62, %v1630_v0  ;;  %v1819_v9 = vld [vmem:[#allocation5 + $0x1c4] sm:$0xf]  ;;  %v1833_v16 = vld [vmem:[#allocation5 + $0x234] sm:$0xf] }
  0x53   :  { %823 = vmatpush.bf16.msrb.mxu1 %v1605_v61  ;;  %v1502_v61 = vld [vmem:[#allocation5 + $0x1d8] sm:$0xf0]  ;;  %v1494_v10 = vld [vmem:[#allocation5 + $0x1c8] sm:$0xf0]  ;;  %v1561_v14 = vor.u32 %v1835_v5, %v1558_v6  ;;  %v1849_v22 = vld [vmem:[#allocation5 + $0x2b4] sm:$0xf] }
  0x54   :  { %810 = vmatpush.bf16.msrb.mxu0 %v1533_v7  ;;  %v1505_v7 = vor.u32 %v1821_v58, %v1502_v61  ;;  %v1622_v13 = vld [vmem:[#allocation5 + $0x2c8] sm:$0xf0]  ;;  %v1550_v17 = vld [vmem:[#allocation5 + $0x238] sm:$0xf0]  ;;  %v1799_v25 = vld [vmem:[#allocation5 + $0x124] sm:$0xf] }
  0x55   :  { %865 = vmatpush.bf16.msra.mxu2 %v1353_v2  ;;  %v1803_v2 = vld [vmem:[#allocation5 + $0x144] sm:$0xf]  ;;  %v1486_v21 = vld [vmem:[#allocation5 + $0x1b8] sm:$0xf0]  ;;  %v1553_v24 = vor.u32 %v1833_v16, %v1550_v17  ;;  %v1414_v26 = vld [vmem:[#allocation5 + $0x128] sm:$0xf0] }
  0x56   :  { %852 = vmatpush.bf16.msrb.mxu3 %v1281_v11  ;;  %v1851_v11 = vld [vmem:[#allocation5 + $0x2c4] sm:$0xf]  ;;  %v1433_v12 = vor.u32 %v1803_v2, %v1430_v3  ;;  %v1606_v35 = vld [vmem:[#allocation5 + $0x2a8] sm:$0xf0]  ;;  %v1406_v39 = vld [vmem:[#allocation5 + $0x118] sm:$0xf0] }
  0x57   :  { %824 = vmatpush.bf16.msrb.mxu1 %v1597_v15  ;;  %v1801_v15 = vld [vmem:[#allocation5 + $0x134] sm:$0xf]  ;;  %v1625_v18 = vor.u32 %v1851_v11, %v1622_v13  ;;  %v1815_v31 = vld [vmem:[#allocation5 + $0x1a4] sm:$0xf]  ;;  %v1470_v47 = vld [vmem:[#allocation5 + $0x198] sm:$0xf0] }
  0x58   :  { %811 = vmatpush.bf16.msrb.mxu0 %v1525_v23  ;;  %v1614_v23 = vld [vmem:[#allocation5 + $0x2b8] sm:$0xf0]  ;;  %v1847_v34 = vld [vmem:[#allocation5 + $0x2a4] sm:$0xf]  ;;  %v1829_v40 = vld [vmem:[#allocation5 + $0x214] sm:$0xf] }
  0x59   :  { %866 = vmatpush.bf16.msra.mxu2 %v1345_v19  ;;  %v1817_v19 = vld [vmem:[#allocation5 + $0x1b4] sm:$0xf]  ;;  %v1617_v30 = vor.u32 %v1849_v22, %v1614_v23  ;;  %v1609_v43 = vor.u32 %v1847_v34, %v1606_v35  ;;  %v1795_v52 = vld [vmem:[#allocation5 + $0x104] sm:$0xf]  ;;  %v1398_v53 = vld [vmem:[#allocation5 + $0x108] sm:$0xf0] }
  0x5a   :  { %853 = vmatpush.bf16.msrb.mxu3 %v1273_v27  ;;  %v1831_v27 = vld [vmem:[#allocation5 + $0x224] sm:$0xf]  ;;  %v1489_v29 = vor.u32 %v1817_v19, %v1486_v21  ;;  %v1845_v49 = vld [vmem:[#allocation5 + $0x294] sm:$0xf]  ;;  %v1462_v62 = vld [vmem:[#allocation5 + $0x188] sm:$0xf0] }
  0x5b   :  { %825 = vmatpush.bf16.msrb.mxu1 %v1589_v33  ;;  %812 = vmatmul.bf16.vlgmr.msrb.gmra.mxu0 %v2170_v37  ;;  %v1478_v33 = vld [vmem:[#allocation5 + $0x1a8] sm:$0xf0]  ;;  %v1827_v55 = vld [vmem:[#allocation5 + $0x204] sm:$0xf]  ;;  %v1866_v11 = vld [vmem:[#allocation8 + $0x28] sm:$0xff]  ;;  %s1216_s12 = sshll.u32 %s2089_s11, 4  ;;  %s1217_s12 = int_to_ptr.vmem [resolvable:$true] %s1216_s12 }
  0x5c   :  { %874 = vmatpush.bf16.msra.mxu0 %v1457_v28  ;;  %v1542_v28 = vld [vmem:[#allocation5 + $0x228] sm:$0xf0]  ;;  %v1811_v61 = vld [vmem:[#allocation5 + $0x184] sm:$0xf]  ;;  %v1862_v13 = vld [vmem:[#allocation8 + $0x8] sm:$0xff]  ;;  %s1218_s1 = sshll.u32 %s2214_s8, 4  ;;  %s1219_s1 = int_to_ptr.hbm [resolvable:$true] %s1218_s1 }
  0x5d   :  { %867 = vmatpush.bf16.msra.mxu2 %v1337_v38  ;;  %854 = vmatmul.bf16.vlgmr.msrb.gmra.mxu3 %v2156_v60  ;;  %v1497_v60 = vor.u32 %v1819_v9, %v1494_v10  ;;  %v1545_v36 = vor.u32 %v1831_v27, %v1542_v28  ;;  %v1797_v38 = vld [vmem:[#allocation5 + $0x114] sm:$0xf]  ;;  %v1590_v2 = vld [vmem:[#allocation5 + $0x288] sm:$0xf0]  ;;  %v1859_v3 = vld [vmem:[#allocation5 + $0x304] sm:$0xf]  ;;  %v1465_v6 = vor.u32 %v1811_v61, %v1462_v62 }
  0x5e   :  { %902 = vmatpush.bf16.msra.mxu3 %v1585_v32  ;;  %826 = vmatmul.bf16.vlgmr.msrb.gmra.mxu1 %v2172_v44  ;;  %v1417_v32 = vor.u32 %v1799_v25, %v1414_v26  ;;  %v1409_v46 = vor.u32 %v1797_v38, %v1406_v39  ;;  %v1654_v5 = vld [vmem:[#allocation5 + $0x308] sm:$0xf0]  ;;  %v1867_v10 = vld [vmem:[#allocation8 + $0x30] sm:$0xff]  ;;  %s2090_s18 = smov [#allocation11]   ;;  %s1205_s3 = sshll.u32 %s2213_s7, 4  ;;  %s1206_s3 = int_to_ptr.hbm [resolvable:$true] %s1205_s3 }
  0x5f   :  { %888 = vmatpush.bf16.msra.mxu1 %v1521_v41  ;;  %v1534_v41 = vld [vmem:[#allocation5 + $0x218] sm:$0xf0]  ;;  %v1868_v9 = vld [vmem:[#allocation8 + $0x38] sm:$0xff]  ;;  %s1203_s19 = sshll.u32 %s2090_s18, 4  ;;  %s1204_s19 = int_to_ptr.vmem [resolvable:$true] %s1203_s19 }
  0x60   :  { %875 = vmatpush.bf16.msra.mxu0 %v1449_v45  ;;  %868 = vmatmul.bf16.vlgmr.msra.gmra.mxu2 %v2160_v4  ;;  %v1422_v4 = vld [vmem:[#allocation5 + $0x138] sm:$0xf0]  ;;  %v1813_v45 = vld [vmem:[#allocation5 + $0x194] sm:$0xf]  ;;  %v1537_v51 = vor.u32 %v1829_v40, %v1534_v41 }
  0x61   :  { %916 = vmatpush.bf16.msrb.mxu2 %v1649_v42  ;;  %v1425_v20 = vor.u32 %v1801_v15, %v1422_v4  ;;  %v1481_v42 = vor.u32 %v1815_v31, %v1478_v33  ;;  %v1861_v15 = vld [vmem:[#allocation8] sm:$0xff]  ;;  %v1876_v31 = vld [vmem:[#allocation8 + $0x78] sm:$0xff] }
  0x62   :  { %903 = vmatpush.bf16.msra.mxu3 %v1577_v50  ;;  %v1598_v50 = vld [vmem:[#allocation5 + $0x298] sm:$0xf0] }
  0x63   :  { %889 = vmatpush.bf16.msra.mxu1 %v1513_v56  ;;  %v1526_v56 = vld [vmem:[#allocation5 + $0x208] sm:$0xf0]  ;;  %v1601_v58 = vor.u32 %v1845_v49, %v1598_v50 }
  0x64   :  { %876 = vmatpush.bf16.msra.mxu0 %v1441_v59  ;;  %v1401_v59 = vor.u32 %v1795_v52, %v1398_v53  ;;  %v1529_v0 = vor.u32 %v1827_v55, %v1526_v56  ;;  %v1871_v52 = vld [vmem:[#allocation8 + $0x50] sm:$0xff]  ;;  %v1870_v55 = vld [vmem:[#allocation8 + $0x48] sm:$0xff] }
  0x65   :  { %917 = vmatpush.bf16.msrb.mxu2 %v1641_v57  ;;  %v1473_v57 = vor.u32 %v1813_v45, %v1470_v47  ;;  %v1873_v47 = vld [vmem:[#allocation8 + $0x60] sm:$0xff] }
  0x66   :  { %904 = vmatpush.bf16.msra.mxu3 %v1569_v1  ;;  %v1843_v1 = vld [vmem:[#allocation5 + $0x284] sm:$0xf] }
  0x67   :  { %890 = vmatpush.bf16.msra.mxu1 %v1505_v7  ;;  %v1593_v7 = vor.u32 %v1843_v1, %v1590_v2 }
  0x68   :  { %877 = vmatpush.bf16.msra.mxu0 %v1433_v12  ;;  %v1865_v12 = vld [vmem:[#allocation8 + $0x20] sm:$0xff] }
  0x69   :  { %918 = vmatpush.bf16.msrb.mxu2 %v1633_v8  ;;  %v1657_v8 = vor.u32 %v1859_v3, %v1654_v5 }
  0x6a   :  { %905 = vmatpush.bf16.msra.mxu3 %v1561_v14 }
  0x6b   :  { %891 = vmatpush.bf16.msra.mxu1 %v1497_v60 }
  0x6c   :  { %878 = vmatpush.bf16.msra.mxu0 %v1425_v20 }
  0x6d   :  { %919 = vmatpush.bf16.msrb.mxu2 %v1625_v18 }
  0x6e   :  { %906 = vmatpush.bf16.msra.mxu3 %v1553_v24 }
  0x6f   :  { %892 = vmatpush.bf16.msra.mxu1 %v1489_v29 }
  0x70   :  { %879 = vmatpush.bf16.msra.mxu0 %v1417_v32 }
  0x71   :  { %920 = vmatpush.bf16.msrb.mxu2 %v1617_v30 }
  0x72   :  { %907 = vmatpush.bf16.msra.mxu3 %v1545_v36  ;;  %v1875_v36 = vld [vmem:[#allocation8 + $0x70] sm:$0xff] }
  0x73   :  { %893 = vmatpush.bf16.msra.mxu1 %v1481_v42 }
  0x74   :  { %880 = vmatpush.bf16.msra.mxu0 %v1409_v46 }
  0x75   :  { %921 = vmatpush.bf16.msrb.mxu2 %v1609_v43  ;;  %v1874_v43 = vld [vmem:[#allocation8 + $0x68] sm:$0xff] }
  0x76   :  { %908 = vmatpush.bf16.msra.mxu3 %v1537_v51  ;;  %v1872_v51 = vld [vmem:[#allocation8 + $0x58] sm:$0xff] }
  0x77   :  { %894 = vmatpush.bf16.msra.mxu1 %v1473_v57  ;;  %v1869_v57 = vld [vmem:[#allocation8 + $0x40] sm:$0xff] }
  0x78   :  { %881 = vmatpush.bf16.msra.mxu0 %v1401_v59 }
  0x79   :  { %922 = vmatpush.bf16.msrb.mxu2 %v1601_v58 }
  0x7a   :  { %909 = vmatpush.bf16.msra.mxu3 %v1529_v0 }
  0x7b   :  { %895 = vmatpush.bf16.msra.mxu1 %v1465_v6  ;;  %882 = vmatmul.bf16.vlgmr.msra.gmra.mxu0 %v2154_v54  ;;  %v1864_v54 = vld [vmem:[#allocation8 + $0x18] sm:$0xff] }
  0x7d   :  { %910 = vmatmul.bf16.vlgmr.msra.gmra.mxu3 %v2170_v37  ;;  %923 = vmatpush.bf16.msrb.mxu2 %v1593_v7  ;;  %v1863_v37 = vld [vmem:[#allocation8 + $0x10] sm:$0xff] }
  0x7e   :  { %896 = vmatmul.bf16.vlgmr.msra.gmra.mxu1 %v2158_v63  ;;  %v2184_v63 = vld [vmem:[#allocation7] sm:$0x3]  ;;  %1096 = vmatpush.bf16.msrb.mxu3 %v1876_v31 }
  0x7f   :  { %1082 = vmatpush.bf16.msrb.mxu1 %v1868_v9  ;;  %v215_v4 = vperm.slane %v2184_v63, 0  ;;  %v216_v62 = vperm.slane %v2184_v63, 1 }
  0x80   :  { %924 = vmatmul.bf16.vlgmr.msrb.gmra.mxu2 %v2172_v44 }
  0x81   :  { %937 = vmatpush.bf16.msra.mxu2 %v1657_v8 }
  0x82   :  { %1097 = vmatpush.bf16.msrb.mxu3 %v1875_v36 }
  0x83   :  { %1083 = vmatpush.bf16.msrb.mxu1 %v1867_v10 }
  0x86   :  { %1098 = vmatpush.bf16.msrb.mxu3 %v1874_v43 }
  0x87   :  { %1084 = vmatpush.bf16.msrb.mxu1 %v1866_v11 }
  0x8a   :  { %1099 = vmatpush.bf16.msrb.mxu3 %v1873_v47 }
  0x8b   :  { %1085 = vmatpush.bf16.msrb.mxu1 %v1865_v12 }
  0x8e   :  { %1100 = vmatpush.bf16.msrb.mxu3 %v1872_v51 }
  0x8f   :  { %1086 = vmatpush.bf16.msrb.mxu1 %v1864_v54 }
  0x90   :  { %1659 = vmatmul.msk.bf16.vlgmr.msra.gmra.mxu2 %vm744_vm0, %v2166_v48 }
  0x92   :  { %1101 = vmatpush.bf16.msrb.mxu3 %v1871_v52 }
  0x93   :  { %1087 = vmatpush.bf16.msrb.mxu1 %v1863_v37 }
  0x96   :  { %1102 = vmatpush.bf16.msrb.mxu3 %v1870_v55 }
  0x97   :  { %1088 = vmatpush.bf16.msrb.mxu1 %v1862_v13 }
  0x9a   :  { %1103 = vmatpush.bf16.msrb.mxu3 %v1869_v57 }
  0x9b   :  { %1089 = vmatpush.bf16.msrb.mxu1 %v1861_v15 }
  0xb8   :  { %v757_v44 = vpop.f32.mrf.mxu0 }
  0xb9   :  { %v758_v16 = vadd.f32 %v757_v44, %v215_v4 }
  0xbb   :  { %v771_v48 = vpop.f32.mrf.mxu1 }
  0xbc   :  { %v772_v60 = vadd.f32 %v771_v48, %v758_v16 }
  0xbf   :  { %v785_v14 = vpop.f32.mrf.mxu2 }
  0xc0   :  { %v759_v17 = vpop.f32.mrf.mxu0  ;;  %v799_v19 = vpop.f32.mrf.mxu3  ;;  %v786_v22 = vadd.f32 %v785_v14, %v772_v60 }
  0xc1   :  { %v760_v21 = vadd.f32 %v759_v17, %v215_v4 }
  0xc2   :  { %v800_v25 = vadd.f32 %v799_v19, %v786_v22  ;;  %v1884_v19 = vld [vmem:[#allocation10 + $0x38] sm:$0xff]  ;;  %v1881_v22 = vld [vmem:[#allocation10 + $0x20] sm:$0xff] }
  0xc3   :  { %v773_v20 = vpop.f32.mrf.mxu1  ;;  %1181 = vmatpush.bf16.msrb.mxu0 %v1884_v19 }
  0xc4   :  { %v774_v23 = vadd.f32 %v773_v20, %v760_v21  ;;  %v1883_v20 = vld [vmem:[#allocation10 + $0x30] sm:$0xff]  ;;  %v1882_v21 = vld [vmem:[#allocation10 + $0x28] sm:$0xff] }
  0xc7   :  { %v787_v18 = vpop.f32.mrf.mxu2  ;;  %1182 = vmatpush.bf16.msrb.mxu0 %v1883_v20 }
  0xc8   :  { %v788_v28 = vadd.f32 %v787_v18, %v774_v23  ;;  %v801_v30 = vpop.f32.mrf.mxu3  ;;  %v1880_v23 = vld [vmem:[#allocation10 + $0x18] sm:$0xff] }
  0xca   :  { %v802_v32 = vadd.f32 %v801_v30, %v788_v28  ;;  %v1898_v28 = vld [vmem:[%s2210_s4] ss:$0 sm:$0xff] }
  0xcb   :  { %1183 = vmatpush.bf16.msrb.mxu0 %v1882_v21 }
  0xcf   :  { %v841_v26 = vpop.f32.mrf.mxu2  ;;  %1184 = vmatpush.bf16.msrb.mxu0 %v1881_v22 }
  0xd3   :  { %1185 = vmatpush.bf16.msrb.mxu0 %v1880_v23 }
  0xd7   :  { %v843_v40 = vpop.f32.mrf.mxu2 }
  0xd8   :  { %v813_v24 = vpop.f32.mrf.mxu0 }
  0xd9   :  { %v814_v29 = vadd.f32 %v813_v24, %v800_v25  ;;  %v1879_v24 = vld [vmem:[#allocation10 + $0x10] sm:$0xff]  ;;  %v1878_v25 = vld [vmem:[#allocation10 + $0x8] sm:$0xff] }
  0xda   :  { %1186 = vmatpush.bf16.msrb.mxu0 %v1879_v24 }
  0xdb   :  { %v827_v27 = vpop.f32.mrf.mxu1 }
  0xdc   :  { %v828_v33 = vadd.f32 %v827_v27, %v814_v29 }
  0xde   :  { %v842_v39 = vadd.f32 %v841_v26, %v828_v33  ;;  %1187 = vmatpush.bf16.msrb.mxu0 %v1878_v25  ;;  %v1877_v26 = vld [vmem:[#allocation10] sm:$0xff] }
  0xe0   :  { %v815_v34 = vpop.f32.mrf.mxu0  ;;  %v944_v45 = vmax.f32 %v842_v39, 0.0  ;;  %v855_v53 = vpop.f32.mrf.mxu3 }
  0xe1   :  { %v816_v35 = vadd.f32 %v815_v34, %v802_v32  ;;  %v856_v1 = vadd.f32 %v855_v53, %v216_v62 }
  0xe2   :  { %1188 = vmatpush.bf16.msrb.mxu0 %v1877_v26 }
  0xe3   :  { %v829_v38 = vpop.f32.mrf.mxu1  ;;  %v869_v50 = vpop.f32.mrf.mxu2 }
  0xe4   :  { %v830_v41 = vadd.f32 %v829_v38, %v816_v35  ;;  %v870_v6 = vadd.f32 %v869_v50, %v856_v1 }
  0xe6   :  { %v844_v42 = vadd.f32 %v843_v40, %v830_v41  ;;  %v1899_v40 = vld [vmem:[%s2212_s6] ss:$0 sm:$0xff] }
  0xe8   :  { %v946_v46 = vmax.f32 %v844_v42, 0.0  ;;  %v857_v58 = vpop.f32.mrf.mxu3 }
  0xe9   :  { %v858_v3 = vadd.f32 %v857_v58, %v216_v62 }
  0xea   :  { %v948_v49 = vpack.c.bf16 %v946_v46, %v944_v45 }
  0xeb   :  { %v871_v56 = vpop.f32.mrf.mxu2 }
  0xec   :  { %1090 = vmatmul.bf16.vlgmr.msrb.gmra.mxu1 %v948_v49  ;;  %v872_v8 = vadd.f32 %v871_v56, %v858_v3 }
  0xf8   :  { %v883_v59 = vpop.f32.mrf.mxu0 }
  0xf9   :  { %v884_v9 = vadd.f32 %v883_v59, %v870_v6 }
  0xfb   :  { %v897_v0 = vpop.f32.mrf.mxu1 }
  0xfc   :  { %v898_v12 = vadd.f32 %v897_v0, %v884_v9 }
 0x100   :  { %v911_v2 = vpop.f32.mrf.mxu3  ;;  %v885_v7 = vpop.f32.mrf.mxu0 }
 0x101   :  { %v886_v10 = vadd.f32 %v885_v7, %v872_v8  ;;  %v912_v13 = vadd.f32 %v911_v2, %v898_v12 }
 0x103   :  { %v925_v61 = vpop.f32.mrf.mxu2  ;;  %v899_v11 = vpop.f32.mrf.mxu1 }
 0x104   :  { %v900_v44 = vadd.f32 %v899_v11, %v886_v10  ;;  %v926_v15 = vadd.f32 %v925_v61, %v912_v13 }
 0x108   :  { %v913_v54 = vpop.f32.mrf.mxu3 }
 0x109   :  { %v914_v14 = vadd.f32 %v913_v54, %v900_v44 }
 0x10b   :  { %v927_v5 = vpop.f32.mrf.mxu2 }
 0x10c   :  { %v928_v48 = vadd.f32 %v927_v5, %v914_v14 }
 0x113   :  { %v939_v37 = vpop.f32.mrf.mxu2 }
 0x114   :  { %v940_v63 = vadd.f32 %v939_v37, %v926_v15 }
 0x116   :  { %v945_v17 = vmax.f32 %v940_v63, 0.0 }
 0x11b   :  { %v941_v4 = vpop.f32.mrf.mxu2 }
 0x11c   :  { %v942_v16 = vadd.f32 %v941_v4, %v928_v48 }
 0x11e   :  { %v947_v60 = vmax.f32 %v942_v16, 0.0 }
 0x120   :  { %v949_v18 = vpack.c.bf16 %v947_v60, %v945_v17 }
 0x122   :  { %1104 = vmatmul.bf16.vlgmr.msrb.gmra.mxu3 %v949_v18 }
 0x169   :  { %v1091_v27 = vpop.f32.mrf.mxu1 }
 0x16a   :  { %v1092_v29 = vadd.f32 %v1898_v28, %v1091_v27 }
 0x171   :  { %v1093_v33 = vpop.f32.mrf.mxu1 }
 0x172   :  { %v1094_v34 = vadd.f32 %v1898_v28, %v1093_v33 }
 0x1a5   :  { %v1105_v30 = vpop.f32.mrf.mxu3 }
 0x1a6   :  { %v1106_v31 = vadd.f32 %v1105_v30, %v1092_v29 }
 0x1a8   :  { %v1110_v32 = vmax.f32 %v1106_v31, 0.0 }
 0x1aa   :  { %1195 = vst [vmem:[#allocation12] sm:$0xff] %v1110_v32 }
 0x1ad   :  { %v1107_v35 = vpop.f32.mrf.mxu3 }
 0x1ae   :  { %v1108_v36 = vadd.f32 %v1107_v35, %v1094_v34 }
 0x1b0   :  { %v1111_v38 = vmax.f32 %v1108_v36, 0.0 }
 0x1b2   :  { %v1112_v39 = vpack.c.bf16 %v1111_v38, %v1110_v32  ;;  %1196 = vst [vmem:[#allocation12 + $0x8] sm:$0xff] %v1111_v38 }
 0x1b3   :  { %1224 = dma.vmem_to_hbm [thread:$0]  %s1217_s12, 256, %s1219_s1, [#allocation13], %s2079_s13, %s2079_s13, %s2080_s14  }
 0x1b4   :  { %1189 = vmatmul.bf16.vlgmr.msrb.gmra.mxu0 %v1112_v39 }
 0x231   :  { %v1190_v41 = vpop.f32.mrf.mxu0 }
 0x232   :  { %v1191_v42 = vadd.f32 %v1899_v40, %v1190_v41 }
 0x234   :  { %1197 = vst [vmem:[#allocation11] sm:$0xff] %v1191_v42 }
 0x239   :  { %v1192_v43 = vpop.f32.mrf.mxu0 }
 0x23a   :  { %v1193_v45 = vadd.f32 %v1899_v40, %v1192_v43 }
 0x23c   :  { %1198 = vst [vmem:[#allocation11 + $0x8] sm:$0xff] %v1193_v45 }
 0x23d   :  { %1211 = dma.vmem_to_hbm [thread:$0]  %s1204_s19, 256, %s1206_s3, [#allocation4], %s2079_s13, %s2079_s13, %s2080_s14  }
 0x23e   :  { %2074 = dma.done.wait [#allocation4], 256  }
 0x23f   :  { %2075 = vsyncadd [#allocation4], 4294967040 }
 0x240   :  { %2076 = dma.done.wait [#allocation13], 256  }
 0x241   :  { %2077 = vsyncadd [#allocation13], 4294967040 }
 0x242   :  { %1233 = vsyncpa [#allocation3], 1 }
 0x243   :  { %1234 = vsyncpa [#allocation6], 1 }
 0x244   :  { %1235 = vsyncpa [#allocation9], 1 }
 0x245   :  { %1236 = vsyncpa [#allocation4], 1 }
 0x246   :  { %1237 = vsyncpa [#allocation13], 1 }

</bundles_post_ra>
